<compile_context>
chip_gen: v7x
topology: tpu7x:2x2x1
jax: 0.10.0
libtpu: 0.0.40
codegen_flags: <defaults>
</compile_context>

<pallas_src>
import functools

import jax
import jax.numpy as jnp
from jax.experimental import pallas as pl
from jax.experimental.pallas import tpu as pltpu

EPS = 1e-5


def layernorm_kernel(x_ref, gamma_ref, beta_ref, o_ref, *, true_d):
    x = x_ref[...]                                            # (row_tile, d_pad), native dtype
    d_pad = x.shape[-1]
    inv_d = jnp.float32(1.0 / true_d)

    # Pass 1: mean, accumulated in f32 without materializing an f32 tile copy.
    s1 = jnp.sum(x, axis=-1, keepdims=True, dtype=jnp.float32)
    mean = s1 * inv_d

    # Pass 2: centered tile (f32) -> biased variance.  `centered` is reused
    # for the normalize/affine output, so this is the only f32 working tile.
    centered = x.astype(jnp.float32) - mean
    if true_d != d_pad:
        # Padded lanes hold (0 - mean); zero them so they don't pollute var.
        lane = jax.lax.broadcasted_iota(jnp.int32, (1, d_pad), 1)
        centered = jnp.where(lane < true_d, centered, 0.0)
    var = jnp.sum(centered * centered, axis=-1, keepdims=True) * inv_d

    inv = jax.lax.rsqrt(var + EPS)                            # EUP, ~free slot
    g = gamma_ref[...].astype(jnp.float32)                    # (1, d_pad)
    b = beta_ref[...].astype(jnp.float32)                     # (1, d_pad)
    o_ref[...] = (centered * inv * g + b).astype(o_ref.dtype)


def _tpu_vmem_bytes():
    """Physical VMEM per core; falls back to the v7x-conservative 64 MiB."""
    try:
        return int(pltpu.get_tpu_info().vmem_capacity_bytes)
    except Exception:  # not on TPU / older jax field name — be conservative
        return 64 << 20


def _pick_row_tile(rows, d_pad, dtype):
    """Largest HBM-roofline-friendly row tile, generation aware, rounded to
    the sublane pack (8 rows f32, 16 bf16, 32 int8/fp8)."""
    itemsize = jnp.dtype(dtype).itemsize
    pack = 8 * max(1, 4 // itemsize)

    small_vmem = _tpu_vmem_bytes() <= (64 << 20)              # v7x
    target_bytes = (5 << 19) if small_vmem else (4 << 20)     # ~2.5 MiB vs 4 MiB / tile
    row_cap = 2048 if small_vmem else 4096

    row_tile = max(pack, target_bytes // max(1, d_pad * itemsize))
    row_tile = min(row_tile, row_cap)
    row_tile = max(pack, (row_tile // pack) * pack)

    rows_ceil = ((rows + pack - 1) // pack) * pack
    row_tile = min(row_tile, rows_ceil)

    # Give the "parallel" grid axis enough steps to split across v7x's 2 TCs.
    min_steps = 4
    if rows >= min_steps * pack and -(-rows // row_tile) < min_steps:
        cap_for_steps = ((rows // min_steps) // pack) * pack
        row_tile = max(pack, min(row_tile, cap_for_steps))
    return row_tile


@functools.partial(jax.jit, static_argnames=("row_tile",))
def layer_norm(x, gamma, beta, *, row_tile=None):
    """LayerNorm over the last axis of x using a Pallas TPU kernel."""
    orig_shape = x.shape
    d = orig_shape[-1]
    x2 = x.reshape(-1, d)
    rows = x2.shape[0]

    # Lane-dense layout: pad D up to a multiple of 128 (zeros are harmless
    # for sum(x); variance is masked in-kernel; output is sliced back).
    d_pad = max(128, ((d + 127) // 128) * 128)
    if d_pad != d:
        x2 = jnp.pad(x2, ((0, 0), (0, d_pad - d)))
        gamma2 = jnp.pad(gamma.reshape(1, d), ((0, 0), (0, d_pad - d)))
        beta2 = jnp.pad(beta.reshape(1, d), ((0, 0), (0, d_pad - d)))
    else:
        gamma2 = gamma.reshape(1, d)
        beta2 = beta.reshape(1, d)

    if row_tile is None:
        row_tile = _pick_row_tile(rows, d_pad, x.dtype)

    itemsize = jnp.dtype(x.dtype).itemsize
    tile_bytes = row_tile * d_pad * itemsize
    work_f32 = row_tile * d_pad * 4                           # centered f32 tile
    small_vmem = _tpu_vmem_bytes() <= (64 << 20)
    # 2x double-buffered in + 2x double-buffered out + f32 working set + headroom.
    budget = 2 * tile_bytes + 2 * tile_bytes + 2 * work_f32 + (2 << 20)
    vmem_cap = (40 << 20) if small_vmem else (96 << 20)
    vmem_limit = int(min(vmem_cap, max(32 << 20, budget)))

    cost = pl.CostEstimate(
        flops=int(7 * rows * d),
        transcendentals=int(rows),
        bytes_accessed=int(2 * rows * d_pad * itemsize + 2 * d_pad * itemsize),
    )

    out = pl.pallas_call(
        functools.partial(layernorm_kernel, true_d=d),
        out_shape=jax.ShapeDtypeStruct((rows, d_pad), x.dtype),
        grid_spec=pltpu.PrefetchScalarGridSpec(
            num_scalar_prefetch=0,
            grid=(pl.cdiv(rows, row_tile),),
            in_specs=[
                pl.BlockSpec((row_tile, d_pad), lambda i: (i, 0)),
                pl.BlockSpec((1, d_pad), lambda i: (0, 0)),
                pl.BlockSpec((1, d_pad), lambda i: (0, 0)),
            ],
            out_specs=pl.BlockSpec((row_tile, d_pad), lambda i: (i, 0)),
        ),
        compiler_params=pltpu.CompilerParams(
            dimension_semantics=("parallel",),                # megacore / v7x 2-TC split
            vmem_limit_bytes=vmem_limit,
        ),
        cost_estimate=cost,
    )(x2, gamma2, beta2)

    if d_pad != d:
        out = out[:, :d]
    return out.reshape(orig_shape)


if __name__ == "__main__":
    # Small shapes consistent with the module: (batch, seq, embedding_dim)
    batch, seq, embedding_dim = 2, 8, 32

    key = jax.random.PRNGKey(0)
    x = jax.random.normal(key, (batch, seq, embedding_dim), dtype=jnp.float32)

    # nn.LayerNorm defaults: weight (gamma) = ones, bias (beta) = zeros.
    gamma = jnp.ones((embedding_dim,), dtype=jnp.float32)
    beta = jnp.zeros((embedding_dim,), dtype=jnp.float32)

    y = layer_norm(x, gamma, beta)
    jax.block_until_ready(y)

    # Sanity check against a pure-JAX reference.
    mean = jnp.mean(x, axis=-1, keepdims=True)
    var = jnp.mean((x - mean) ** 2, axis=-1, keepdims=True)
    y_ref = (x - mean) / jnp.sqrt(var + EPS) * gamma + beta
    assert jnp.allclose(y, y_ref, atol=1e-4, rtol=1e-5), "mismatch vs reference"

    print("KERNEL_OK")
</pallas_src>

<mosaic_0001>
module attributes {stable_mosaic.version = 11 : i64} {
  func.func @layernorm_kernel(%arg0: i32, %arg1: memref<16x128xf32, #tpu.memory_space<vmem>>, %arg2: memref<1x128xf32, #tpu.memory_space<vmem>>, %arg3: memref<1x128xf32, #tpu.memory_space<vmem>>, %arg4: memref<16x128xf32, #tpu.memory_space<vmem>>) attributes {dimension_semantics = [#tpu.dimension_semantics<parallel>], iteration_bounds = array<i64: 1>, scalar_prefetch = 0 : i64, scratch_operands = 0 : i64, tpu.core_type = #tpu.core_type<tc>, window_params = [{transform_indices = @transform_0, window_bounds = array<i64: 16, 128>}, {pipeline_mode = #tpu.pipeline_mode<synchronous>, transform_indices = @transform_1, window_bounds = array<i64: 1, 128>}, {pipeline_mode = #tpu.pipeline_mode<synchronous>, transform_indices = @transform_2, window_bounds = array<i64: 1, 128>}, {transform_indices = @transform_3, window_bounds = array<i64: 16, 128>}]} {
    %c0 = arith.constant 0 : index
    %c0_0 = arith.constant 0 : index
    %0 = vector.load %arg1[%c0, %c0_0] : memref<16x128xf32, #tpu.memory_space<vmem>>, vector<16x128xf32>
    %cst = arith.constant dense<0.000000e+00> : vector<16xf32>
    %1 = vector.multi_reduction <add>, %0, %cst [1] : vector<16x128xf32> to vector<16xf32>
    %2 = vector.shape_cast %1 : vector<16xf32> to vector<16x1xf32>
    %cst_1 = arith.constant 3.125000e-02 : f32
    %3 = vector.broadcast %cst_1 : f32 to vector<16x1xf32>
    %4 = arith.mulf %2, %3 : vector<16x1xf32>
    %5 = vector.broadcast %4 : vector<16x1xf32> to vector<16x128xf32>
    %6 = arith.subf %0, %5 : vector<16x128xf32>
    %7 = tpu.iota {dimensions = array<i32: 1>} : vector<1x128xi32>
    %c32_i32 = arith.constant 32 : i32
    %8 = vector.broadcast %c32_i32 : i32 to vector<1x128xi32>
    %9 = arith.cmpi slt, %7, %8 : vector<1x128xi32>
    %cst_2 = arith.constant 0.000000e+00 : f32
    %10 = vector.shape_cast %9 : vector<1x128xi1> to vector<1x128xi1>
    %11 = vector.broadcast %10 : vector<1x128xi1> to vector<16x128xi1>
    %12 = vector.broadcast %cst_2 : f32 to vector<16x128xf32>
    %13 = arith.select %11, %6, %12 : vector<16x128xi1>, vector<16x128xf32>
    %14 = arith.mulf %13, %13 : vector<16x128xf32>
    %cst_3 = arith.constant dense<0.000000e+00> : vector<16xf32>
    %15 = vector.multi_reduction <add>, %14, %cst_3 [1] : vector<16x128xf32> to vector<16xf32>
    %16 = vector.shape_cast %15 : vector<16xf32> to vector<16x1xf32>
    %cst_4 = arith.constant 3.125000e-02 : f32
    %17 = vector.broadcast %cst_4 : f32 to vector<16x1xf32>
    %18 = arith.mulf %16, %17 : vector<16x1xf32>
    %cst_5 = arith.constant 9.99999974E-6 : f32
    %19 = vector.broadcast %cst_5 : f32 to vector<16x1xf32>
    %20 = arith.addf %18, %19 : vector<16x1xf32>
    %21 = math.rsqrt %20 : vector<16x1xf32>
    %c0_6 = arith.constant 0 : index
    %c0_7 = arith.constant 0 : index
    %22 = vector.load %arg2[%c0_6, %c0_7] : memref<1x128xf32, #tpu.memory_space<vmem>>, vector<1x128xf32>
    %c0_8 = arith.constant 0 : index
    %c0_9 = arith.constant 0 : index
    %23 = vector.load %arg3[%c0_8, %c0_9] : memref<1x128xf32, #tpu.memory_space<vmem>>, vector<1x128xf32>
    %24 = vector.broadcast %21 : vector<16x1xf32> to vector<16x128xf32>
    %25 = arith.mulf %13, %24 : vector<16x128xf32>
    %26 = vector.broadcast %22 : vector<1x128xf32> to vector<16x128xf32>
    %27 = arith.mulf %25, %26 : vector<16x128xf32>
    %28 = vector.broadcast %23 : vector<1x128xf32> to vector<16x128xf32>
    %29 = arith.addf %27, %28 : vector<16x128xf32>
    %c0_10 = arith.constant 0 : index
    %c0_11 = arith.constant 0 : index
    %30 = vector.load %arg4[%c0_10, %c0_11] : memref<16x128xf32, #tpu.memory_space<vmem>>, vector<16x128xf32>
    tpu.vector_store %arg4[%c0_10, %c0_11], %29 {strides = array<i32>} : memref<16x128xf32, #tpu.memory_space<vmem>>, vector<16x128xf32>,
    return
  }
  func.func @transform_0(%arg0: i32) -> (i32, i32) {
    %c0_i32 = arith.constant 0 : i32
    %c0_i32_0 = arith.constant 0 : i32
    return %arg0, %c0_i32 : i32, i32
  }
  func.func @transform_1(%arg0: i32) -> (i32, i32) {
    %c0_i32 = arith.constant 0 : i32
    %c0_i32_0 = arith.constant 0 : i32
    %c0_i32_1 = arith.constant 0 : i32
    return %c0_i32, %c0_i32_0 : i32, i32
  }
  func.func @transform_2(%arg0: i32) -> (i32, i32) {
    %c0_i32 = arith.constant 0 : i32
    %c0_i32_0 = arith.constant 0 : i32
    %c0_i32_1 = arith.constant 0 : i32
    return %c0_i32, %c0_i32_0 : i32, i32
  }
  func.func @transform_3(%arg0: i32) -> (i32, i32) {
    %c0_i32 = arith.constant 0 : i32
    %c0_i32_0 = arith.constant 0 : i32
    return %arg0, %c0_i32 : i32, i32
  }
}

</mosaic_0001>

<bundles_post_ra>
// kernel: layer_norm.1
= control target key start
LH: loop header
LB: loop body
LE: loop exit
PB: predicated region body
PF: predicated region fallthrough
CT: control target
= control target key end

     0   :  { %v24_v2 = vlaneseq  ;;  %s113_s0 = inlined_call_operand.vmem [shape: f32[16,128], index: 0, kind: input, shape index: {}]   ;;  %s114_s1 = inlined_call_operand.vmem [shape: f32[1,128], index: 1, kind: input, shape index: {}]   ;;  %s115_s2 = inlined_call_operand.vmem [shape: f32[1,128], index: 2, kind: input, shape index: {}]   ;;  %s116_s3 = inlined_call_operand.vmem [shape: f32[16,128], index: 3, kind: output, shape index: {}]  }
   0x1   :  { %v14_v0 = vld [vmem:[%s113_s0] sm:$0xff]  ;;  %v15_v1 = vld [vmem:[%s113_s0 + $0x8] sm:$0xff] }
   0x2   :  { %16 = vadd.xlane.f32.xlu0 %v14_v0  ;;  %v25_v3 = vand.u32 127, %v24_v2  ;;  %v69_v21 = vld [vmem:[%s114_s1] ss:$0 sm:$0xff] }
   0x3   :  { %v70_v23 = vld [vmem:[%s115_s2] ss:$0 sm:$0xff] }
   0x4   :  { %vm26_vm0 = vcmp.lt.s32.totalorder %v25_v3, 32 }
   0x6   :  { %18 = vadd.xlane.f32.xlu0 %v15_v1 }
  0x8f   :  { %v17_v4 = vpop.xlane.xlu0 %16 }
  0x90   :  { %v20_v5 = vmul.f32 0.03125, %v17_v4 }
  0x92   :  { %v22_v6 = vsub.f32 %v14_v0, %v20_v5 }
  0x93   :  { %v19_v7 = vpop.xlane.xlu0 %18 }
  0x94   :  { %v21_v8 = vmul.f32 0.03125, %v19_v7  ;;  %v29_v9 = vsel %vm26_vm0, %v22_v6, 0.0 }
  0x95   :  { %v31_v10 = vmul.f32 %v29_v9, %v29_v9 }
  0x96   :  { %v23_v11 = vsub.f32 %v15_v1, %v21_v8 }
  0x97   :  { %33 = vadd.xlane.f32.xlu1 %v31_v10 }
  0x98   :  { %v30_v12 = vsel %vm26_vm0, %v23_v11, 0.0 }
  0x99   :  { %v32_v13 = vmul.f32 %v30_v12, %v30_v12 }
  0x9b   :  { %35 = vadd.xlane.f32.xlu1 %v32_v13 }
 0x124   :  { %v34_v14 = vpop.xlane.xlu1 %33 }
 0x125   :  { %v37_v15 = vmul.f32 0.03125, %v34_v14 }
 0x127   :  { %v39_v16 = vadd.f32 1e-05, %v37_v15 }
 0x128   :  { %v36_v17 = vpop.xlane.xlu1 %35 }
 0x129   :  { %71 = vrsqrt.f32 %v39_v16  ;;  %v38_v18 = vmul.f32 0.03125, %v36_v17 }
 0x12b   :  { %v40_v19 = vadd.f32 1e-05, %v38_v18 }
 0x12d   :  { %73 = vrsqrt.f32 %v40_v19 }
 0x133   :  { %v72_v20 = vpop.eup %71 }
 0x134   :  { %v45_v22 = vmul.f32 %v72_v20, %v29_v9 }
 0x136   :  { %v53_v24 = vmul.f32 %v69_v21, %v45_v22 }
 0x137   :  { %v74_v25 = vpop.eup %73 }
 0x138   :  { %v61_v26 = vadd.f32 %v70_v23, %v53_v24  ;;  %v46_v27 = vmul.f32 %v74_v25, %v30_v12 }
 0x13a   :  { %63 = vst [vmem:[%s116_s3] sm:$0xff] %v61_v26  ;;  %v54_v28 = vmul.f32 %v69_v21, %v46_v27 }
 0x13c   :  { %v62_v29 = vadd.f32 %v70_v23, %v54_v28 }
 0x13e   :  { %64 = vst [vmem:[%s116_s3 + $0x8] sm:$0xff] %v62_v29 }

</bundles_post_ra>
